<compile_context>
chip_gen: v5e
topology: v5e:2x2
jax: 0.10.0
libtpu: 0.0.40
codegen_flags: <defaults>
</compile_context>

<pallas_src>
import functools

import jax
import jax.numpy as jnp
from jax.experimental import pallas as pl
from jax.experimental.pallas import tpu as pltpu

NEG_INF = -10000.0  # matches the reference module's neg_inf


def _round_up(x, m):
    return -(-x // m) * m


# ---------------------------------------------------------------------------
# Kernels
# ---------------------------------------------------------------------------
def _span_pooled(span_ref, span_len, proj_wT_ref, proj_b_ref, query_ref,
                 mention_pooling):
    """Project the span block through the MXU and pool it.  Returns (Bb, E) f32."""
    Bb, Wp, E = span_ref.shape
    # One big (Bb*Wp, E) @ (E, E) MXU matmul; Wp % 8 == 0 so the reshapes are
    # layout no-ops.
    span_flat = span_ref[...].reshape(Bb * Wp, E)
    span_p_flat = (jnp.dot(span_flat, proj_wT_ref[...],
                           preferred_element_type=jnp.float32)
                   + proj_b_ref[...])                              # (Bb*Wp, E) f32
    span_p = span_p_flat.reshape(Bb, Wp, E)

    len3 = span_len[:, :, None]                                    # (Bb, 1, 1)
    w_pos = jax.lax.broadcasted_iota(jnp.int32, (Bb, Wp, 1), 1)
    mask3 = w_pos < len3                                           # (Bb, Wp, 1)

    if mention_pooling == 'max':
        pooled = jnp.max(jnp.where(mask3, span_p, NEG_INF), axis=1)
    elif mention_pooling == 'mean':
        # no zero-length guard, matching the reference
        pooled = (jnp.sum(jnp.where(mask3, span_p, 0.0), axis=1)
                  / span_len.astype(jnp.float32))
    elif mention_pooling == 'attention':
        # span scores through the MXU: (Bb*Wp, E) @ (E, 1)
        scores = jnp.dot(span_p_flat, query_ref[...],
                         preferred_element_type=jnp.float32).reshape(Bb, Wp, 1)
        scores = jnp.where(mask3, scores, NEG_INF)
        m = jnp.max(scores, axis=1, keepdims=True)                 # (Bb, 1, 1)
        e = jnp.exp(scores - m)                                    # (Bb, Wp, 1)
        denom = jnp.sum(e, axis=1)                                 # (Bb, 1)
        # weighted sum (W is small -> VPU), normalization deferred & exact
        num = jnp.sum(span_p * e, axis=1)                          # (Bb, E)
        pooled = num / denom
    else:
        raise ValueError(f"unknown pooling {mention_pooling}")
    return pooled


def _span_only_kernel(*refs, mention_pooling):
    it = iter(refs)
    span_len_ref = next(it)                         # (Bb, 1) int32
    span_ref = next(it)                             # (Bb, Wp, E) compute dtype
    proj_wT_ref = next(it)                          # (E, E) compute dtype
    proj_b_ref = next(it)                           # (1, E) f32
    query_ref = next(it) if mention_pooling == 'attention' else None
    out_ref = next(it)                              # (Bb, E) f32
    out_ref[...] = _span_pooled(span_ref, span_len_ref[...], proj_wT_ref,
                                proj_b_ref, query_ref, mention_pooling)


def _context_kernel(*refs, mention_pooling):
    it = iter(refs)
    span_len_ref = next(it)                         # (Bb, 1) int32
    span_ref = next(it)                             # (Bb, Wp, E) compute dtype
    proj_wT_ref = next(it)                          # (E, E) compute dtype
    proj_b_ref = next(it)                           # (1, E) f32
    query_ref = next(it) if mention_pooling == 'attention' else None
    sent_len_ref = next(it)                         # (Bb, 1) int32
    sent_ref = next(it)                             # (Bb, Sb, E) compute dtype
    ctx_wT_ref = next(it)                           # (E, E) compute dtype
    ctx_b_ref = next(it)                            # (1, E) f32
    out_ref = next(it)                              # (Bb, 2E) f32
    pooled_sc = next(it)                            # (Bb, E)    f32 scratch
    span_q_sc = next(it)                            # (Bb, 1, E) f32 scratch
    m_sc = next(it)                                 # (Bb, 1, 1) f32 scratch
    l_sc = next(it)                                 # (Bb, 1, 1) f32 scratch
    acc_sc = next(it)                               # (Bb, 1, E) f32 scratch

    Bb, Sb, E = sent_ref.shape
    s_step = pl.program_id(1)
    n_s = pl.num_programs(1)

    @pl.when(s_step == 0)
    def _init():
        pooled = _span_pooled(span_ref, span_len_ref[...], proj_wT_ref,
                              proj_b_ref, query_ref, mention_pooling)
        pooled_sc[...] = pooled
        span_q = (jnp.dot(pooled.astype(ctx_wT_ref.dtype), ctx_wT_ref[...],
                          preferred_element_type=jnp.float32)
                  + ctx_b_ref[...])                                 # (Bb, E) f32
        span_q_sc[...] = span_q[:, None, :]
        m_sc[...] = jnp.full(m_sc.shape, -jnp.inf, dtype=jnp.float32)
        l_sc[...] = jnp.zeros(l_sc.shape, jnp.float32)
        acc_sc[...] = jnp.zeros(acc_sc.shape, jnp.float32)

    # ---- online-softmax context attention over the current sentence chunk --
    sent_flat = sent_ref[...].reshape(Bb * Sb, E)      # Sb % 8 == 0: layout no-op
    sent_p = (jnp.dot(sent_flat, proj_wT_ref[...],
                      preferred_element_type=jnp.float32)
              + proj_b_ref[...]).reshape(Bb, Sb, E)    # (Bb, Sb, E) f32

    scores = jnp.einsum('bqe,bse->bqs', span_q_sc[...], sent_p,
                        preferred_element_type=jnp.float32)          # (Bb,1,Sb)
    s_pos = jax.lax.broadcasted_iota(jnp.int32, (Bb, 1, Sb), 2) + s_step * Sb
    mask = s_pos < sent_len_ref[...][:, :, None]                     # (Bb,1,Sb)
    scores = jnp.where(mask, scores, NEG_INF)

    m_prev = m_sc[...]
    m_new = jnp.maximum(m_prev, jnp.max(scores, axis=2, keepdims=True))
    alpha = jnp.exp(m_prev - m_new)
    p = jnp.exp(scores - m_new)                                      # (Bb,1,Sb)
    l_sc[...] = alpha * l_sc[...] + jnp.sum(p, axis=2, keepdims=True)
    acc_sc[...] = alpha * acc_sc[...] + jnp.einsum(
        'bqs,bse->bqe', p, sent_p, preferred_element_type=jnp.float32)
    m_sc[...] = m_new

    @pl.when(s_step == n_s - 1)
    def _finalize():
        ctx = (acc_sc[...] / l_sc[...]).reshape(Bb, E)   # exact normalization
        out_ref[:, :E] = pooled_sc[...]
        out_ref[:, E:] = ctx


# ---------------------------------------------------------------------------
# VMEM budgeting / block selection
# ---------------------------------------------------------------------------
def _vmem_capacity_bytes():
    try:
        return int(pltpu.get_tpu_info().vmem_capacity_bytes)
    except Exception:
        return 64 * 1024 * 1024          # conservative (v7x per-TensorCore)


def _vmem_estimate(block_b, block_s, Wp, E, with_context, attention,
                   in_itemsize):
    """Rough per-kernel VMEM footprint: double-buffered activation blocks,
    single-buffered weights, outputs, f32 intermediates and scratch."""
    Ep = _round_up(E, 128)
    b = 0
    b += 2 * block_b * Wp * Ep * in_itemsize            # span block (x2 buffers)
    b += 2 * block_b * 128 * 4                          # span lengths (lane padded)
    b += Ep * Ep * in_itemsize + 8 * Ep * 4             # proj_wT + proj_b
    if attention:
        b += _round_up(E, 8) * 128 * 4                  # query (E,1), lane padded
    if with_context:
        b += 2 * block_b * block_s * Ep * in_itemsize   # sentence chunk (x2)
        b += 2 * block_b * 128 * 4                      # sentence lengths
        b += Ep * Ep * in_itemsize + 8 * Ep * 4         # ctx_wT + ctx_b
    out_cols = 2 * Ep if with_context else Ep
    b += 2 * block_b * out_cols * 4                     # output block (x2)
    # f32 intermediates (projected slabs + mask/exp temporaries): 2x slack
    b += 2 * block_b * Wp * Ep * 4
    if with_context:
        b += 2 * block_b * block_s * Ep * 4
        b += block_b * Ep * 4 * 3 + block_b * 128 * 4 * 2   # scratch accumulators
    return b


def _choose_blocks(B, Wp, S8, E, with_context, attention, in_itemsize, budget):
    """Pick (block_b, block_s): as large as the VMEM budget allows (multiples
    of 8), with a preference for an even (>=2) number of batch grid steps so
    both v7x TensorCores get balanced, pipelined work."""
    bb_cap = max(8, min(512, _round_up(max(1, 2048 // Wp), 8), _round_up(B, 8)))
    bb_cands = list(range(bb_cap, 0, -8))
    if with_context:
        bs_cands = sorted({min(S8, 512)} |
                          {x for x in (512, 256, 128, 64, 32, 16, 8) if x <= S8},
                          reverse=True)
    else:
        bs_cands = [None]

    def fits(bb, bs):
        return _vmem_estimate(bb, bs or 0, Wp, E, with_context, attention,
                              in_itemsize) <= budget

    chosen = None
    for bb in bb_cands:
        for bs in bs_cands:
            if fits(bb, bs):
                chosen = (bb, bs)
                break
        if chosen is not None:
            break
    if chosen is None:
        chosen = (8, 8 if with_context else None)
    bb, bs = chosen

    nb = -(-B // bb)
    if nb < 2 or nb % 2:
        pad0 = _round_up(B, bb) - B
        for bb2 in range(bb, 0, -8):
            nb2 = -(-B // bb2)
            pad2 = _round_up(B, bb2) - B
            if (nb2 >= 2 and nb2 % 2 == 0
                    and pad2 <= max(pad0, B // 8) and fits(bb2, bs)):
                bb = bb2
                break
    return bb, bs


# ---------------------------------------------------------------------------
# Wrapper
# ---------------------------------------------------------------------------
def mention_feature_extractor(sentence, sentence_lengths, span, span_lengths,
                              span_left, span_right, params,
                              mention_pooling='max', with_context=False,
                              compute_dtype=jnp.float32,
                              block_b=None, block_s=None):
    """Pallas implementation of MentionFeatureExtractor.forward (eval mode)."""
    del span_left, span_right       # dead inputs in the reference forward
    B, S, E = sentence.shape
    W = span.shape[1]
    f32 = jnp.float32
    attention = (mention_pooling == 'attention')
    in_itemsize = jnp.dtype(compute_dtype).itemsize

    Wp = _round_up(W, 8)
    S8 = _round_up(S, 8)

    cap = _vmem_capacity_bytes()
    budget = int(0.7 * cap)

    bb_auto, bs_auto = _choose_blocks(B, Wp, S8, E, with_context, attention,
                                      in_itemsize, budget)
    if block_b is None:
        block_b = bb_auto
    if with_context and block_s is None:
        block_s = bs_auto

    Bp = _round_up(B, block_b)
    n_b = Bp // block_b

    # ---- pad + cast in the wrapper (masks always use the real lengths) -----
    span_c = jnp.pad(span.astype(compute_dtype),
                     ((0, Bp - B), (0, Wp - W), (0, 0)))
    span_len2 = jnp.pad(span_lengths.reshape(B, 1).astype(jnp.int32),
                        ((0, Bp - B), (0, 0)), constant_values=1)

    proj_wT = params['proj_w'].T.astype(compute_dtype)
    proj_b = params['proj_b'].reshape(1, E).astype(f32)

    inputs = [span_len2, span_c, proj_wT, proj_b]
    if attention:
        inputs.append(params['query'].reshape(E, 1).astype(f32))

    if with_context:
        Sp = _round_up(S8, block_s)
        n_s = Sp // block_s
        sent_c = jnp.pad(sentence.astype(compute_dtype),
                         ((0, Bp - B), (0, Sp - S), (0, 0)))
        sent_len2 = jnp.pad(sentence_lengths.reshape(B, 1).astype(jnp.int32),
                            ((0, Bp - B), (0, 0)), constant_values=1)
        ctx_wT = params['ctx_w'].T.astype(compute_dtype)
        ctx_b = params['ctx_b'].reshape(1, E).astype(f32)
        inputs += [sent_len2, sent_c, ctx_wT, ctx_b]

    est = _vmem_estimate(block_b, block_s or 0, Wp, E, with_context, attention,
                         in_itemsize)
    vmem_limit = max(16 * 1024 * 1024,
                     min(int(0.7 * cap), int(1.5 * est) + (1 << 20)))

    def run(single_buffer_weights):
        def const_spec(shape):
            idx = lambda *_: (0,) * len(shape)
            if single_buffer_weights:
                # grid-invariant blocks: double-buffering buys nothing
                return pl.BlockSpec(shape, idx, pipeline_mode=pl.Buffered(1))
            return pl.BlockSpec(shape, idx)

        if with_context:
            in_specs = [
                pl.BlockSpec((block_b, 1), lambda i, s: (i, 0)),
                pl.BlockSpec((block_b, Wp, E), lambda i, s: (i, 0, 0)),
                const_spec((E, E)),
                const_spec((1, E)),
            ]
            if attention:
                in_specs.append(const_spec((E, 1)))
            in_specs += [
                pl.BlockSpec((block_b, 1), lambda i, s: (i, 0)),
                pl.BlockSpec((block_b, block_s, E), lambda i, s: (i, s, 0)),
                const_spec((E, E)),
                const_spec((1, E)),
            ]
            out_shape = jax.ShapeDtypeStruct((Bp, 2 * E), f32)
            out_specs = pl.BlockSpec((block_b, 2 * E), lambda i, s: (i, 0))
            grid = (n_b, n_s)
            scratch = [pltpu.VMEM((block_b, E), f32),
                       pltpu.VMEM((block_b, 1, E), f32),
                       pltpu.VMEM((block_b, 1, 1), f32),
                       pltpu.VMEM((block_b, 1, 1), f32),
                       pltpu.VMEM((block_b, 1, E), f32)]
            kernel = functools.partial(_context_kernel,
                                       mention_pooling=mention_pooling)
            dims = ("parallel", "arbitrary")
        else:
            in_specs = [
                pl.BlockSpec((block_b, 1), lambda i: (i, 0)),
                pl.BlockSpec((block_b, Wp, E), lambda i: (i, 0, 0)),
                const_spec((E, E)),
                const_spec((1, E)),
            ]
            if attention:
                in_specs.append(const_spec((E, 1)))
            out_shape = jax.ShapeDtypeStruct((Bp, E), f32)
            out_specs = pl.BlockSpec((block_b, E), lambda i: (i, 0))
            grid = (n_b,)
            scratch = []
            kernel = functools.partial(_span_only_kernel,
                                       mention_pooling=mention_pooling)
            dims = ("parallel",)

        grid_spec = pltpu.PrefetchScalarGridSpec(
            num_scalar_prefetch=0,
            grid=grid,
            in_specs=in_specs,
            out_specs=out_specs,
            scratch_shapes=scratch,
        )
        out = pl.pallas_call(
            kernel,
            grid_spec=grid_spec,
            out_shape=out_shape,
            compiler_params=pltpu.CompilerParams(
                dimension_semantics=dims,
                vmem_limit_bytes=vmem_limit),
        )(*inputs)
        return jax.block_until_ready(out)

    try:
        out = run(single_buffer_weights=True)
    except Exception:
        # TODO(synk): pl.Buffered(1) single-buffering unsupported on this jax
        # version — fall back to default double-buffered weight blocks.
        out = run(single_buffer_weights=False)

    return out[:B]


# ---------------------------------------------------------------------------
# Pure-JAX reference (mirror of the PyTorch forward) for validation
# ---------------------------------------------------------------------------
def reference_forward(sentence, sentence_lengths, span, span_lengths, params,
                      mention_pooling, with_context):
    B, S, E = sentence.shape
    W = span.shape[1]
    proj = lambda x: x @ params['proj_w'].T + params['proj_b']
    span_p = proj(span)
    sent_p = proj(sentence)
    span_mask = jnp.arange(W)[None, :] < span_lengths[:, None]
    if mention_pooling == 'max':
        pooled = jnp.max(jnp.where(span_mask[:, :, None], span_p, NEG_INF), axis=1)
    elif mention_pooling == 'mean':
        pooled = (jnp.sum(jnp.where(span_mask[:, :, None], span_p, 0.0), axis=1)
                  / span_lengths[:, None].astype(jnp.float32))
    else:
        scores = jnp.einsum('e,bwe->bw', params['query'], span_p)
        scores = jnp.where(span_mask, scores, NEG_INF)
        a = jax.nn.softmax(scores, axis=1)
        pooled = jnp.einsum('bwe,bw->be', span_p, a)
    features = pooled
    if with_context:
        sent_mask = jnp.arange(S)[None, :] < sentence_lengths[:, None]
        sq = pooled @ params['ctx_w'].T + params['ctx_b']
        scores = jnp.einsum('be,bwe->bw', sq, sent_p)
        scores = jnp.where(sent_mask, scores, NEG_INF)
        a = jax.nn.softmax(scores, axis=1)
        ctx = jnp.einsum('bwe,bw->be', sent_p, a)
        features = jnp.concatenate([pooled, ctx], axis=1)
    return features


if __name__ == "__main__":
    B, S, W, E = 16, 16, 8, 32
    key = jax.random.PRNGKey(0)
    ks = jax.random.split(key, 10)

    sentence = jax.random.normal(ks[0], (B, S, E), dtype=jnp.float32)
    span = jax.random.normal(ks[1], (B, W, E), dtype=jnp.float32)
    sentence_lengths = jax.random.randint(ks[2], (B,), 4, S + 1).astype(jnp.int32)
    span_lengths = jax.random.randint(ks[3], (B,), 1, W + 1).astype(jnp.int32)
    span_left = jnp.zeros((B,), jnp.int32)      # unused (dead code in reference)
    span_right = span_lengths                   # unused (dead code in reference)

    params = {
        'proj_w': 0.05 * jax.random.normal(ks[4], (E, E), dtype=jnp.float32),
        'proj_b': 0.05 * jax.random.normal(ks[5], (E,), dtype=jnp.float32),
        'query':  0.05 * jax.random.normal(ks[6], (E,), dtype=jnp.float32),
        'ctx_w':  0.05 * jax.random.normal(ks[7], (E, E), dtype=jnp.float32),
        'ctx_b':  0.05 * jax.random.normal(ks[8], (E,), dtype=jnp.float32),
    }

    configs = [
        ('max',       False, jnp.float32),
        ('mean',      False, jnp.float32),
        ('attention', False, jnp.float32),
        ('max',       True,  jnp.float32),
        ('attention', True,  jnp.float32),
        ('attention', True,  jnp.bfloat16),   # bf16 activations/weights, f32 accumulation
    ]
    for pooling, with_ctx, cdt in configs:
        out = mention_feature_extractor(sentence, sentence_lengths, span,
                                        span_lengths, span_left, span_right,
                                        params, mention_pooling=pooling,
                                        with_context=with_ctx,
                                        compute_dtype=cdt)
        out = jax.block_until_ready(out)
        ref = reference_forward(sentence, sentence_lengths, span, span_lengths,
                                params, pooling, with_ctx)
        assert out.shape == ref.shape, (pooling, with_ctx, out.shape, ref.shape)
        tol = 3e-2 if cdt == jnp.bfloat16 else 1e-4
        assert jnp.allclose(out, ref, rtol=tol, atol=tol), \
            f"mismatch for ({pooling}, with_context={with_ctx}, dtype={cdt})"

    print("KERNEL_OK")
</pallas_src>

<mosaic_0001>
module attributes {stable_mosaic.version = 11 : i64} {
  func.func @_span_only_kernel(%arg0: i32, %arg1: memref<8x1xi32, #tpu.memory_space<vmem>>, %arg2: memref<8x8x32xf32, #tpu.memory_space<vmem>>, %arg3: memref<32x32xf32, #tpu.memory_space<vmem>>, %arg4: memref<1x32xf32, #tpu.memory_space<vmem>>, %arg5: memref<8x32xf32, #tpu.memory_space<vmem>>) attributes {dimension_semantics = [#tpu.dimension_semantics<parallel>], iteration_bounds = array<i64: 2>, scalar_prefetch = 0 : i64, scratch_operands = 0 : i64, tpu.core_type = #tpu.core_type<tc>, window_params = [{transform_indices = @transform_0, window_bounds = array<i64: 8, 1>}, {transform_indices = @transform_1, window_bounds = array<i64: 8, 8, 32>}, {pipeline_mode = #tpu.pipeline_mode<synchronous>, transform_indices = @transform_2, window_bounds = array<i64: 32, 32>}, {pipeline_mode = #tpu.pipeline_mode<synchronous>, transform_indices = @transform_3, window_bounds = array<i64: 1, 32>}, {transform_indices = @transform_4, window_bounds = array<i64: 8, 32>}]} {
    %c0 = arith.constant 0 : index
    %c0_0 = arith.constant 0 : index
    %0 = vector.load %arg1[%c0, %c0_0] : memref<8x1xi32, #tpu.memory_space<vmem>>, vector<8x1xi32>
    %c0_1 = arith.constant 0 : index
    %c0_2 = arith.constant 0 : index
    %c0_3 = arith.constant 0 : index
    %1 = vector.load %arg2[%c0_1, %c0_2, %c0_3] : memref<8x8x32xf32, #tpu.memory_space<vmem>>, vector<8x8x32xf32>
    %2 = vector.shape_cast %1 : vector<8x8x32xf32> to vector<64x32xf32>
    %c0_4 = arith.constant 0 : index
    %c0_5 = arith.constant 0 : index
    %3 = vector.load %arg3[%c0_4, %c0_5] : memref<32x32xf32, #tpu.memory_space<vmem>>, vector<32x32xf32>
    %cst = arith.constant dense<0.000000e+00> : vector<64x32xf32>
    %4 = tpu.matmul %2, %3, %cst {dimension_numbers = #tpu.dot_dimension_numbers<[1], [0], [0], [1], [0, 0, 1, 1], [], []>} : vector<64x32xf32>, vector<32x32xf32>, vector<64x32xf32> -> vector<64x32xf32>
    %c0_6 = arith.constant 0 : index
    %c0_7 = arith.constant 0 : index
    %5 = vector.load %arg4[%c0_6, %c0_7] : memref<1x32xf32, #tpu.memory_space<vmem>>, vector<1x32xf32>
    %6 = vector.broadcast %5 : vector<1x32xf32> to vector<64x32xf32>
    %7 = arith.addf %4, %6 : vector<64x32xf32>
    %8 = vector.shape_cast %7 : vector<64x32xf32> to vector<8x8x32xf32>
    %9 = vector.shape_cast %0 : vector<8x1xi32> to vector<8x1x1xi32>
    %10 = tpu.iota {dimensions = array<i32: 1>} : vector<8x8x1xi32>
    %11 = vector.broadcast %9 : vector<8x1x1xi32> to vector<8x8x1xi32>
    %12 = arith.cmpi slt, %10, %11 : vector<8x8x1xi32>
    %cst_8 = arith.constant -1.000000e+04 : f32
    %13 = vector.shape_cast %12 : vector<8x8x1xi1> to vector<8x8x1xi1>
    %14 = vector.broadcast %13 : vector<8x8x1xi1> to vector<8x8x32xi1>
    %15 = vector.broadcast %cst_8 : f32 to vector<8x8x32xf32>
    %16 = arith.select %14, %8, %15 : vector<8x8x32xi1>, vector<8x8x32xf32>
    %cst_9 = arith.constant dense<0xFF800000> : vector<8x32xf32>
    %17 = vector.multi_reduction <maximumf>, %16, %cst_9 [1] : vector<8x8x32xf32> to vector<8x32xf32>
    %c0_10 = arith.constant 0 : index
    %c0_11 = arith.constant 0 : index
    %18 = vector.load %arg5[%c0_10, %c0_11] : memref<8x32xf32, #tpu.memory_space<vmem>>, vector<8x32xf32>
    tpu.vector_store %arg5[%c0_10, %c0_11], %17 {strides = array<i32>} : memref<8x32xf32, #tpu.memory_space<vmem>>, vector<8x32xf32>,
    return
  }
  func.func @transform_0(%arg0: i32) -> (i32, i32) {
    %c0_i32 = arith.constant 0 : i32
    %c0_i32_0 = arith.constant 0 : i32
    return %arg0, %c0_i32 : i32, i32
  }
  func.func @transform_1(%arg0: i32) -> (i32, i32, i32) {
    %c0_i32 = arith.constant 0 : i32
    %c0_i32_0 = arith.constant 0 : i32
    %c0_i32_1 = arith.constant 0 : i32
    return %arg0, %c0_i32, %c0_i32_0 : i32, i32, i32
  }
  func.func @transform_2(%arg0: i32) -> (i32, i32) {
    %c0_i32 = arith.constant 0 : i32
    %c0_i32_0 = arith.constant 0 : i32
    %c0_i32_1 = arith.constant 0 : i32
    return %c0_i32, %c0_i32_0 : i32, i32
  }
  func.func @transform_3(%arg0: i32) -> (i32, i32) {
    %c0_i32 = arith.constant 0 : i32
    %c0_i32_0 = arith.constant 0 : i32
    %c0_i32_1 = arith.constant 0 : i32
    return %c0_i32, %c0_i32_0 : i32, i32
  }
  func.func @transform_4(%arg0: i32) -> (i32, i32) {
    %c0_i32 = arith.constant 0 : i32
    %c0_i32_0 = arith.constant 0 : i32
    return %arg0, %c0_i32 : i32, i32
  }
}

module attributes {stable_mosaic.version = 11 : i64} {
  func.func @_span_only_kernel(%arg0: i32, %arg1: memref<8x1xi32, #tpu.memory_space<vmem>>, %arg2: memref<8x8x32xf32, #tpu.memory_space<vmem>>, %arg3: memref<32x32xf32, #tpu.memory_space<vmem>>, %arg4: memref<1x32xf32, #tpu.memory_space<vmem>>, %arg5: memref<8x32xf32, #tpu.memory_space<vmem>>) attributes {dimension_semantics = [#tpu.dimension_semantics<parallel>], iteration_bounds = array<i64: 2>, scalar_prefetch = 0 : i64, scratch_operands = 0 : i64, tpu.core_type = #tpu.core_type<tc>, window_params = [{transform_indices = @transform_0, window_bounds = array<i64: 8, 1>}, {transform_indices = @transform_1, window_bounds = array<i64: 8, 8, 32>}, {pipeline_mode = #tpu.pipeline_mode<synchronous>, transform_indices = @transform_2, window_bounds = array<i64: 32, 32>}, {pipeline_mode = #tpu.pipeline_mode<synchronous>, transform_indices = @transform_3, window_bounds = array<i64: 1, 32>}, {transform_indices = @transform_4, window_bounds = array<i64: 8, 32>}]} {
    %c0 = arith.constant 0 : index
    %c0_0 = arith.constant 0 : index
    %0 = vector.load %arg1[%c0, %c0_0] : memref<8x1xi32, #tpu.memory_space<vmem>>, vector<8x1xi32>
    %c0_1 = arith.constant 0 : index
    %c0_2 = arith.constant 0 : index
    %c0_3 = arith.constant 0 : index
    %1 = vector.load %arg2[%c0_1, %c0_2, %c0_3] : memref<8x8x32xf32, #tpu.memory_space<vmem>>, vector<8x8x32xf32>
    %2 = vector.shape_cast %1 : vector<8x8x32xf32> to vector<64x32xf32>
    %c0_4 = arith.constant 0 : index
    %c0_5 = arith.constant 0 : index
    %3 = vector.load %arg3[%c0_4, %c0_5] : memref<32x32xf32, #tpu.memory_space<vmem>>, vector<32x32xf32>
    %cst = arith.constant dense<0.000000e+00> : vector<64x32xf32>
    %4 = tpu.matmul %2, %3, %cst {dimension_numbers = #tpu.dot_dimension_numbers<[1], [0], [0], [1], [0, 0, 1, 1], [], []>} : vector<64x32xf32>, vector<32x32xf32>, vector<64x32xf32> -> vector<64x32xf32>
    %c0_6 = arith.constant 0 : index
    %c0_7 = arith.constant 0 : index
    %5 = vector.load %arg4[%c0_6, %c0_7] : memref<1x32xf32, #tpu.memory_space<vmem>>, vector<1x32xf32>
    %6 = vector.broadcast %5 : vector<1x32xf32> to vector<64x32xf32>
    %7 = arith.addf %4, %6 : vector<64x32xf32>
    %8 = vector.shape_cast %7 : vector<64x32xf32> to vector<8x8x32xf32>
    %9 = vector.shape_cast %0 : vector<8x1xi32> to vector<8x1x1xi32>
    %10 = tpu.iota {dimensions = array<i32: 1>} : vector<8x8x1xi32>
    %11 = vector.broadcast %9 : vector<8x1x1xi32> to vector<8x8x1xi32>
    %12 = arith.cmpi slt, %10, %11 : vector<8x8x1xi32>
    %cst_8 = arith.constant -1.000000e+04 : f32
    %13 = vector.shape_cast %12 : vector<8x8x1xi1> to vector<8x8x1xi1>
    %14 = vector.broadcast %13 : vector<8x8x1xi1> to vector<8x8x32xi1>
    %15 = vector.broadcast %cst_8 : f32 to vector<8x8x32xf32>
    %16 = arith.select %14, %8, %15 : vector<8x8x32xi1>, vector<8x8x32xf32>
    %cst_9 = arith.constant dense<0xFF800000> : vector<8x32xf32>
    %17 = vector.multi_reduction <maximumf>, %16, %cst_9 [1] : vector<8x8x32xf32> to vector<8x32xf32>
    %c0_10 = arith.constant 0 : index
    %c0_11 = arith.constant 0 : index
    %18 = vector.load %arg5[%c0_10, %c0_11] : memref<8x32xf32, #tpu.memory_space<vmem>>, vector<8x32xf32>
    tpu.vector_store %arg5[%c0_10, %c0_11], %17 {strides = array<i32>} : memref<8x32xf32, #tpu.memory_space<vmem>>, vector<8x32xf32>,
    return
  }
  func.func @transform_0(%arg0: i32) -> (i32, i32) {
    %c0_i32 = arith.constant 0 : i32
    %c0_i32_0 = arith.constant 0 : i32
    return %arg0, %c0_i32 : i32, i32
  }
  func.func @transform_1(%arg0: i32) -> (i32, i32, i32) {
    %c0_i32 = arith.constant 0 : i32
    %c0_i32_0 = arith.constant 0 : i32
    %c0_i32_1 = arith.constant 0 : i32
    return %arg0, %c0_i32, %c0_i32_0 : i32, i32, i32
  }
  func.func @transform_2(%arg0: i32) -> (i32, i32) {
    %c0_i32 = arith.constant 0 : i32
    %c0_i32_0 = arith.constant 0 : i32
    %c0_i32_1 = arith.constant 0 : i32
    return %c0_i32, %c0_i32_0 : i32, i32
  }
  func.func @transform_3(%arg0: i32) -> (i32, i32) {
    %c0_i32 = arith.constant 0 : i32
    %c0_i32_0 = arith.constant 0 : i32
    %c0_i32_1 = arith.constant 0 : i32
    return %c0_i32, %c0_i32_0 : i32, i32
  }
  func.func @transform_4(%arg0: i32) -> (i32, i32) {
    %c0_i32 = arith.constant 0 : i32
    %c0_i32_0 = arith.constant 0 : i32
    return %arg0, %c0_i32 : i32, i32
  }
}

</mosaic_0001>

<bundles_post_ra>
// kernel: tpu_custom_call.1
= control target key start
LH: loop header
LB: loop body
LE: loop exit
PB: predicated region body
PF: predicated region fallthrough
CT: control target
= control target key end

     0   :  { %9 = vsyncpa [#allocation3], 0  ;;  %s1060_s0 = inlined_call_operand.vmem [shape: s32[16,1], index: 0, kind: input, shape index: {}]   ;;  %s1061_s1 = inlined_call_operand.hbm [shape: f32[16,8,32], index: 1, kind: input, shape index: {}]   ;;  %s1062_s2 = inlined_call_operand.hbm [shape: f32[32,32], index: 2, kind: input, shape index: {}]   ;;  %s1063_s3 = inlined_call_operand.vmem [shape: f32[1,32], index: 3, kind: input, shape index: {}]   ;;  %s1064_s4 = inlined_call_operand.hbm [shape: f32[16,32], index: 4, kind: output, shape index: {}]  }
   0x1   :  { %11 = vsyncpa [#allocation3 + $0x1], 0 }
   0x2   :  { %12 = vsyncpa [#allocation6], 0 }
   0x3   :  { %13 = vsyncpa [#allocation4], 0 }
   0x4   :  { %15 = vsyncpa [#allocation4 + $0x1], 0  ;;  %s859_s15 = smov 0   ;;  %s861_s16 = smov 0  }
   0x5   :  { %s863_s17 = smov 0   ;;  %s865_s18 = smov 0  }
   0x6 LB: > { %s880_s19 = sadd.s32 4294967295, %s828_s18   ;;  %s597_s20 = sadd.s32 4294967294, %s828_s18   ;;  %s828_s18 = sphi %s865_s18, %s1074_s18   ;;  %s824_s17 = sphi %s863_s17, %s1073_s17   ;;  %s820_s16 = sphi %s861_s16, %s1072_s16   ;;  %s816_s15 = sphi %s859_s15, %s1071_s15  }
   0x7   : > { %p67_p0 = scmp.ne.s32.totalorder %s820_s16, %s816_s15  ;;  %p68_p1 = scmp.eq.s32.totalorder %s880_s19, 0 }
   0x8   : > { %p133_p2 = scmp.eq.s32.totalorder %s880_s19, 1  ;;  %p139_p3 = scmp.eq.s32.totalorder %s597_s20, 1 }
   0x9   : > { %p889_p4 = por %p68_p1, %p67_p0  ;;  %p598_p5 = scmp.ge.s32.totalorder %s828_s18, 1 }
   0xa   : > { %p894_p6 = por %p139_p3, %p67_p0  ;;  %p146_p7 = scmp.lt.s32.totalorder %s828_s18, 3 }
   0xb   : > { %s157_s25 = sshll.u32 %s1062_s2, 4  ;;  %s830_s27 = smov [#allocation5]   ;;  %s158_s25 = int_to_ptr.hbm [resolvable:$true] %s157_s25 }
   0xc   : > { %p902_p8 = pnand %p598_p5, %p146_p7  ;;  %s159_s28 = sshll.u32 %s830_s27, 4  ;;  %s160_s28 = int_to_ptr.vmem [resolvable:$true] %s159_s28 }
   0xd   : > { %s912_s29 = sadd.s32 1, %s828_s18   ;;  %s831_s30 = smov 128  }
   0xe   : > { %p642_p9 = pneg %p902_p8  ;;  %s832_s5 = smov 8  }
   0xf   : > { %s51_s6 = ssub.s32 %s828_s18, %s912_s29  ;;  %s54_s7 = sadd.s32 1, %s824_s17 }
  0x10   : > { %p643_p10 = pnand %p642_p9, %p68_p1  ;;  %p52_p12 = scmp.eq.s32.totalorder %s51_s6, 0 }
  0x11   : > { %p61_p13 = scmp.ne.s32.totalorder %s824_s17, %s820_s16  ;;  %p62_p0 = scmp.eq.s32.totalorder %s828_s18, 0 }
  0x12   : > { %645 = dma.hbm_to_vmem [thread:$0]  (!%p643_p10), %s158_s25, 512, %s160_s28, [#allocation6], %s831_s30, %s831_s30, %s832_s5  }
  0x13   : > { %s924_s8 = scalar_select %p52_p12, %s824_s17, %s54_s7  }
  0x14   : > { %p928_p3 = por %p133_p2, %p61_p13  ;;  %p655_p5 = scmp.lt.s32.totalorder %s828_s18, 2 }
  0x15   : > { %s183_s10 = sand.u32 1, %s824_s17   ;;  %s621_s11 = sshll.u32 %s828_s18, 6 }
  0x16   : > { %p63_p7 = por %p62_p0, %p61_p13  ;;  %s601_s12 = sshll.u32 %s183_s10, 6 }
  0x17   : > { %s192_s20 = scalar_lea.hbm %s1061_s1, %s621_s11  ;;  %s187_s24 = scalar_lea.vmem [#allocation2], %s601_s12 }
  0x18   : > { %s193_s23 = sshll.u32 %s192_s20, 4  ;;  %s195_s25 = sshll.u32 %s187_s24, 4  ;;  %s194_s23 = int_to_ptr.hbm [resolvable:$true] %s193_s23  ;;  %s196_s25 = int_to_ptr.vmem [resolvable:$true] %s195_s25 }
  0x19   : > { %p938_p9 = pnand %p655_p5, %p63_p7  ;;  %s184_s28 = scalar_lea.sflag [#allocation3], %s183_s10 }
  0x1a   : > { %s728_s6 = sshra.s32 %s194_s23, 4  ;;  %s735_s12 = scalar_lea.hbm %s1061_s1, 128  ;;  %s729_s6 = int_to_ptr.hbm [resolvable:$true] %s728_s6 }
  0x1b   : > { %s730_s7 = scalar_lea.hbm %s729_s6, 64  ;;  %p732_p10 = pneg %p938_p9 }
  0x1c   : > { %p731_p2 = scmp.ne.s32.totalorder %s729_s6, %s730_s7  ;;  %p736_p0 = scmp.lt.s32.totalorder %s729_s6, %s1061_s1 }
  0x1d   : > { %p737_p5 = scmp.lt.s32.totalorder %s735_s12, %s730_s7 }
  0x1e   : > { %p733_p12 = pnand %p732_p10, %p731_p2 }
  0x1f   : > { %p738_p7 = por %p737_p5, %p736_p0 }
  0x20   : > { %p734_p13 = pneg %p733_p12 }
  0x22   : > { %p739_p11 = pnand %p738_p7, %p734_p13 }
  0x24   : > { %742 = shalt.err (!%p739_p11)
}
  0x25   : > { %649 = dma.hbm_to_vmem [thread:$0]  (!%p938_p9), %s194_s23, 1024, %s196_s25, %s184_s28, %s831_s30, %s831_s30, %s832_s5  }
  0x26   : > { %207 = sbr.rel (%p902_p8) target bundleno = 220 (0xdc), region = 36  ;;  %s958_s10 = sand.u32 (!%p902_p8), 1, %s820_s16  }
  0x27   : > { %s605_s24 = sshll.u32 (!%p902_p8), %s958_s10, 6  ;;  %s210_s6 = scalar_lea.sflag (!%p902_p8), [#allocation3], %s958_s10 }
  0x28   : > { %s962_s7 = scalar_lea.vmem (!%p902_p8), [#allocation2], %s605_s24 }
  0x2b   : > { %803 = dma.done.wait (%p889_p4), %s210_s6, 1024  }
  0x2c   : > { %805 = vsyncadd (%p889_p4), %s210_s6, 4294966272 }
  0x2d   : > { %807 = dma.done.wait (%p68_p1), [#allocation6], 512  }
  0x2e   : > { %809 = vsyncadd (%p68_p1), [#allocation6], 4294966784  ;;  %p248_p8 = scmp.lt.s32.totalorder %s880_s19, 1  ;;  %v833_v0 = vmov 0   ;;  %v343_v1 = vlaneseq  ;;  %v265_v2 = vld [vmem:[#allocation5 + $0x18] sm:$0xff]  ;;  %v264_v3 = vld [vmem:[#allocation5 + $0x10] sm:$0xff] }
  0x2f   : > { %694 = vset.pattern.permute.xlu0 %v833_v0  ;;  %695 = vset.pattern.permute.xlu1 %v833_v0  ;;  %v263_v6 = vld [vmem:[#allocation5 + $0x8] sm:$0xff]  ;;  %v262_v11 = vld [vmem:[#allocation5] sm:$0xff]  ;;  %vm270_vm2 = vcmask 261120   ;;  %v256_v20 = vld [vmem:[%s962_s7 + $0x10] sm:$0xff]  ;;  %s607_s28 = sshll.u32 %s958_s10, 3  ;;  %s618_s11 = sshll.u32 %s880_s19, 3 }
  0x30   : > { %s249_s26 = scalar_select %p248_p8, %s880_s19, 1  ;;  %696 = vset.pattern.permute.xlu2 %v833_v0  ;;  %v980_v4 = vshrl.u32 %v343_v1, 7  ;;  %307 = vmatpush.msra.mxu0 %v265_v2  ;;  %v254_v19 = vld [vmem:[%s962_s7] sm:$0xff]  ;;  %v260_v23 = vld [vmem:[%s962_s7 + $0x30] sm:$0xff]  ;;  %v255_v31 = vld [vmem:[%s962_s7 + $0x8] sm:$0xff] }
  0x31   : > { %622 = vmatpush.msra.mxu1 %v265_v2  ;;  %623 = vmatpush.msra.mxu2 %v265_v2  ;;  %v258_v22 = vld [vmem:[%s962_s7 + $0x20] sm:$0xff]  ;;  %v257_v32 = vld [vmem:[%s962_s7 + $0x18] sm:$0xff]  ;;  %v259_v34 = vld [vmem:[%s962_s7 + $0x28] sm:$0xff]  ;;  %s500_s14 = scalar_lea.hbm %s1064_s4, %s618_s11  ;;  %s247_s19 = scalar_lea.vmem [#allocation7], %s607_s28 }
  0x32   : > { %s608_s21 = sshll.u32 %s249_s26, 3  ;;  %624 = vmatpush.msra.mxu3 %v265_v2  ;;  %308 = vmatpush.msra.mxu0 %v264_v3  ;;  %v261_v35 = vld [vmem:[%s962_s7 + $0x38] sm:$0xff]  ;;  %v697_v42 = vld [vmem:[%s1063_s3] ss:$0 sm:$0xff]  ;;  %s502_s20 = sshll.u32 %s247_s19, 4  ;;  %s503_s20 = int_to_ptr.vmem [resolvable:$true] %s502_s20 }
  0x33   : > { %s251_s23 = scalar_lea.vmem %s1060_s0, %s608_s21  ;;  %625 = vmatpush.msra.mxu1 %v264_v3  ;;  %626 = vmatpush.msra.mxu2 %v264_v3  ;;  %s504_s24 = sshll.u32 %s500_s14, 4  ;;  %s505_s24 = int_to_ptr.hbm [resolvable:$true] %s504_s24 }
  0x34   : > { %v253_v5 = vld [vmem:[%s251_s23] sm:$0xff]  ;;  %627 = vmatpush.msra.mxu3 %v264_v3  ;;  %309 = vmatpush.msra.mxu0 %v263_v6  ;;  %s490_s6 = scalar_lea.sflag [#allocation4], %s958_s10  ;;  %s772_s7 = sshra.s32 %s505_s24, 4  ;;  %s773_s7 = int_to_ptr.hbm [resolvable:$true] %s772_s7 }
  0x35   : > { %v345_v7 = vperm.slane %v253_v5, 0  ;;  %v337_v8 = vrot.slane %v253_v5, 2  ;;  %v336_v9 = vrot.slane %v253_v5, 1  ;;  %v338_v10 = vrot.slane %v253_v5, 3  ;;  %628 = vmatpush.msra.mxu1 %v263_v6  ;;  %629 = vmatpush.msra.mxu2 %v263_v6  ;;  %s774_s26 = scalar_lea.hbm %s773_s7, 8  ;;  %s778_s5 = scalar_lea.hbm %s1064_s4, 16 }
  0x36   : > { %v339_v13 = vrot.slane %v253_v5, 4  ;;  %630 = vmatpush.msra.mxu3 %v263_v6  ;;  %v340_v17 = vrot.slane %v253_v5, 5  ;;  %310 = vmatpush.msra.mxu0 %v262_v11  ;;  %v341_v24 = vrot.slane %v253_v5, 6  ;;  %v342_v27 = vrot.slane %v253_v5, 7  ;;  %p775_p1 = scmp.ne.s32.totalorder %s773_s7, %s774_s26  ;;  %p779_p9 = scmp.lt.s32.totalorder %s773_s7, %s1064_s4 }
  0x37   : > { %vm353_vm0 = vcmp.lt.s32.totalorder %v980_v4, %v345_v7  ;;  %v347_v12 = vperm.slane %v337_v8, 0  ;;  %v346_v15 = vperm.slane %v336_v9, 0  ;;  %v348_v21 = vperm.slane %v338_v10, 0  ;;  %631 = vmatpush.msra.mxu1 %v262_v11  ;;  %632 = vmatpush.msra.mxu2 %v262_v11  ;;  %p780_p2 = scmp.lt.s32.totalorder %s778_s5, %s774_s26 }
  0x38   : > { %v361_v14 = vsel %vm353_vm0, 1, %v833_v0  ;;  %v349_v16 = vperm.slane %v339_v13, 0  ;;  %633 = vmatpush.msra.mxu3 %v262_v11  ;;  %609 = vmatmul.msk.f32.vlgmr.msra.gmra.mxu0 %vm270_vm2, %v254_v19  ;;  %v350_v26 = vperm.slane %v340_v17, 0  ;;  %v351_v29 = vperm.slane %v341_v24, 0  ;;  %p776_p4 = pnand %p775_p1, %p928_p3 }
  0x39   : > { %vm355_vm1 = vcmp.lt.s32.totalorder %v980_v4, %v347_v12  ;;  %370 = vperm.xlu0 %694, %v361_v14   ;;  %vm354_vm4 = vcmp.lt.s32.totalorder %v980_v4, %v346_v15  ;;  %611 = vmatmul.msk.f32.vlgmr.msra.gmra.mxu1 %vm270_vm2, %v256_v20  ;;  %vm356_vm5 = vcmp.lt.s32.totalorder %v980_v4, %v348_v21  ;;  %v352_v33 = vperm.slane %v342_v27, 0  ;;  %p781_p10 = por %p780_p2, %p779_p9 }
  0x3a   : > { %v363_v18 = vsel %vm355_vm1, 1, %v833_v0  ;;  %vm357_vm3 = vcmp.lt.s32.totalorder %v980_v4, %v349_v16  ;;  %613 = vmatmul.msk.f32.vlgmr.msra.gmra.mxu2 %vm270_vm2, %v258_v22  ;;  %615 = vmatmul.msk.f32.vlgmr.msra.gmra.mxu3 %vm270_vm2, %v260_v23  ;;  %v362_v28 = vsel %vm354_vm4, 1, %v833_v0  ;;  %v364_v30 = vsel %vm356_vm5, 1, %v833_v0  ;;  %p777_p11 = pneg %p776_p4 }
  0x3b   : > { %376 = vperm.xlu1 %695, %v363_v18   ;;  %v365_v25 = vsel %vm357_vm3, 1, %v833_v0  ;;  %vm358_vm6 = vcmp.lt.s32.totalorder %v980_v4, %v350_v26  ;;  %vm359_vm7 = vcmp.lt.s32.totalorder %v980_v4, %v351_v29  ;;  %vm360_vm8 = vcmp.lt.s32.totalorder %v980_v4, %v352_v33 }
  0x3c   : > { %382 = vperm.xlu2 %696, %v365_v25   ;;  %v366_v36 = vsel %vm358_vm6, 1, %v833_v0  ;;  %v367_v37 = vsel %vm359_vm7, 1, %v833_v0  ;;  %v368_v38 = vsel %vm360_vm8, 1, %v833_v0  ;;  %vm473_vm1 = vcmask 1041409   ;;  %p782_p12 = pnand %p781_p10, %p777_p11 }
  0x3d   : > { %vm475_vm3 = vcmask 1042434   ;;  %vm477_vm4 = vcmask 1043459   ;;  %vm479_vm5 = vcmask 1044484   ;;  %vm481_vm6 = vcmask 1045509  }
  0x3e   : > { %vm483_vm7 = vcmask 1046534   ;;  %vm485_vm8 = vcmask 1047559  }
  0x40   : > { %610 = vmatmul.msk.f32.gmra.mxu0 %vm270_vm2, %v255_v31 }
  0x41   : > { %373 = vperm.xlu0 %694, %v362_v28   ;;  %612 = vmatmul.msk.f32.gmra.mxu1 %vm270_vm2, %v257_v32 }
  0x42   : > { %614 = vmatmul.msk.f32.gmra.mxu2 %vm270_vm2, %v259_v34  ;;  %616 = vmatmul.msk.f32.gmra.mxu3 %vm270_vm2, %v261_v35 }
  0x43   : > { %379 = vperm.xlu1 %695, %v364_v30  }
  0x44   : > { %385 = vperm.xlu2 %696, %v366_v36  }
  0x49   : > { %388 = vperm.xlu0 %694, %v367_v37  }
  0x4b   : > { %391 = vperm.xlu1 %695, %v368_v38  }
  0x96   : > { %v383_v50 = vpop.permute.xlu2 %382 }
  0x97   : > { %vm397_vm11 = vcmp.eq.s32.totalorder %v383_v50, 1 }
  0x9e   : > { %v386_v15 = vpop.permute.xlu2 %385 }
  0x9f   : > { %vm398_vm0 = vcmp.eq.s32.totalorder %v386_v15, 1 }
  0xab   : > { %v371_v39 = vpop.permute.xlu0 %370 }
  0xac   : > { %vm393_vm9 = vcmp.eq.s32.totalorder %v371_v39, 1 }
  0xad   : > { %v377_v40 = vpop.permute.xlu1 %376 }
  0xae   : > { %vm395_vm10 = vcmp.eq.s32.totalorder %v377_v40, 1 }
  0xb3   : > { %v374_v41 = vpop.permute.xlu0 %373 }
  0xb4   : > { %vm394_vm13 = vcmp.eq.s32.totalorder %v374_v41, 1 }
  0xb5   : > { %v312_v43 = vpop.f32.mrf.mxu0  ;;  %v380_v49 = vpop.permute.xlu1 %379 }
  0xb6   : > { %v318_v44 = vpop.f32.mrf.mxu1  ;;  %v313_v45 = vadd.f32 %v697_v42, %v312_v43  ;;  %vm396_vm14 = vcmp.eq.s32.totalorder %v380_v49, 1 }
  0xb7   : > { %v319_v46 = vadd.f32 %v697_v42, %v318_v44 }
  0xb8   : > { %v401_v47 = vsel %vm393_vm9, %v313_v45, -10000.0 }
  0xb9   : > { %v403_v48 = vsel %vm395_vm10, %v319_v46, -10000.0  ;;  %v409_v51 = vsel %vm270_vm2, %v401_v47, -inf }
  0xba   : > { %v423_v52 = vsel %vm270_vm2, %v403_v48, -inf  ;;  %v410_v53 = vrot.slane %v409_v51, 4 }
  0xbb   : > { %v424_v54 = vrot.slane %v423_v52, 4  ;;  %v389_v55 = vpop.permute.xlu0 %388 }
  0xbc   : > { %v411_v58 = vmax.f32 %v409_v51, %v410_v53  ;;  %vm399_vm12 = vcmp.eq.s32.totalorder %v389_v55, 1 }
  0xbd   : > { %v324_v56 = vpop.f32.mrf.mxu2  ;;  %v330_v57 = vpop.f32.mrf.mxu3  ;;  %v425_v1 = vmax.f32 %v423_v52, %v424_v54 }
  0xbe   : > { %v325_v59 = vadd.f32 %v697_v42, %v324_v56  ;;  %v331_v60 = vadd.f32 %v697_v42, %v330_v57  ;;  %v315_v61 = vpop.f32.mrf.mxu0  ;;  %v321_v62 = vpop.f32.mrf.mxu1  ;;  %v412_v6 = vrot.slane %v411_v58, 2 }
  0xbf   : > { %v316_v63 = vadd.f32 %v697_v42, %v315_v61  ;;  %v322_v0 = vadd.f32 %v697_v42, %v321_v62  ;;  %v426_v12 = vrot.slane %v425_v1, 2  ;;  %v392_v13 = vpop.permute.xlu1 %391 }
  0xc0   : > { %v405_v2 = vsel %vm397_vm11, %v325_v59, -10000.0  ;;  %v407_v3 = vsel %vm399_vm12, %v331_v60, -10000.0  ;;  %v413_v20 = vmax.f32 %v411_v58, %v412_v6  ;;  %vm400_vm15 = vcmp.eq.s32.totalorder %v392_v13, 1 }
  0xc1   : > { %v437_v4 = vsel %vm270_vm2, %v405_v2, -inf  ;;  %v451_v5 = vsel %vm270_vm2, %v407_v3, -inf  ;;  %v402_v8 = vsel %vm394_vm13, %v316_v63, -10000.0  ;;  %v404_v9 = vsel %vm396_vm14, %v322_v0, -10000.0 }
  0xc2   : > { %v438_v7 = vrot.slane %v437_v4, 4  ;;  %v416_v10 = vsel %vm270_vm2, %v402_v8, -inf  ;;  %v430_v11 = vsel %vm270_vm2, %v404_v9, -inf  ;;  %v452_v14 = vrot.slane %v451_v5, 4 }
  0xc3   : > { %v417_v16 = vrot.slane %v416_v10, 4  ;;  %v431_v17 = vrot.slane %v430_v11, 4  ;;  %v427_v26 = vmax.f32 %v425_v1, %v426_v12  ;;  %v414_v32 = vrot.slane %v413_v20, 1 }
  0xc4   : > { %v439_v21 = vmax.f32 %v437_v4, %v438_v7  ;;  %v453_v27 = vmax.f32 %v451_v5, %v452_v14 }
  0xc5   : > { %v327_v18 = vpop.f32.mrf.mxu2  ;;  %v333_v19 = vpop.f32.mrf.mxu3  ;;  %v418_v22 = vmax.f32 %v416_v10, %v417_v16  ;;  %v432_v23 = vmax.f32 %v430_v11, %v431_v17  ;;  %v428_v38 = vrot.slane %v427_v26, 1  ;;  %v415_v43 = vmax.f32 %v413_v20, %v414_v32 }
  0xc6   : > { %v328_v24 = vadd.f32 %v697_v42, %v327_v18  ;;  %v334_v25 = vadd.f32 %v697_v42, %v333_v19  ;;  %v440_v33 = vrot.slane %v439_v21, 2  ;;  %v454_v39 = vrot.slane %v453_v27, 2 }
  0xc7   : > { %v419_v28 = vrot.slane %v418_v22, 2  ;;  %v433_v29 = vrot.slane %v432_v23, 2  ;;  %v429_v49 = vmax.f32 %v427_v26, %v428_v38 }
  0xc8   : > { %v406_v30 = vsel %vm398_vm0, %v328_v24, -10000.0  ;;  %v408_v31 = vsel %vm400_vm15, %v334_v25, -10000.0  ;;  %v441_v44 = vmax.f32 %v439_v21, %v440_v33  ;;  %v455_v50 = vmax.f32 %v453_v27, %v454_v39 }
  0xc9   : > { %v420_v34 = vmax.f32 %v418_v22, %v419_v28  ;;  %v434_v35 = vmax.f32 %v432_v23, %v433_v29  ;;  %v444_v36 = vsel %vm270_vm2, %v406_v30, -inf  ;;  %v458_v37 = vsel %vm270_vm2, %v408_v31, -inf }
  0xca   : > { %v445_v41 = vrot.slane %v444_v36, 4  ;;  %v459_v42 = vrot.slane %v458_v37, 4  ;;  %v442_v54 = vrot.slane %v441_v44, 1  ;;  %v456_v59 = vrot.slane %v455_v50, 1 }
  0xcb   : > { %v421_v40 = vrot.slane %v420_v34, 1  ;;  %v435_v46 = vrot.slane %v434_v35, 1 }
  0xcc   : > { %v446_v47 = vmax.f32 %v444_v36, %v445_v41  ;;  %v460_v48 = vmax.f32 %v458_v37, %v459_v42  ;;  %v443_v63 = vmax.f32 %v441_v44, %v442_v54  ;;  %v457_v1 = vmax.f32 %v455_v50, %v456_v59 }
  0xcd   : > { %v422_v45 = vmax.f32 %v420_v34, %v421_v40  ;;  %v436_v56 = vmax.f32 %v434_v35, %v435_v46 }
  0xce   : > { %v447_v52 = vrot.slane %v446_v47, 2  ;;  %v461_v53 = vrot.slane %v460_v48, 2 }
  0xcf   : > { %v474_v51 = vsel %vm473_vm1, %v422_v45, %v415_v43 }
  0xd0   : > { %v476_v55 = vsel %vm475_vm3, %v429_v49, %v474_v51  ;;  %v448_v57 = vmax.f32 %v446_v47, %v447_v52  ;;  %v462_v58 = vmax.f32 %v460_v48, %v461_v53 }
  0xd1   : > { %v478_v60 = vsel %vm477_vm4, %v436_v56, %v476_v55 }
  0xd2   : > { %v449_v61 = vrot.slane %v448_v57, 1  ;;  %v463_v62 = vrot.slane %v462_v58, 1  ;;  %v480_v2 = vsel %vm479_vm5, %v443_v63, %v478_v60 }
  0xd4   : > { %v450_v0 = vmax.f32 %v448_v57, %v449_v61  ;;  %v464_v4 = vmax.f32 %v462_v58, %v463_v62 }
  0xd6   : > { %v482_v3 = vsel %vm481_vm6, %v450_v0, %v480_v2 }
  0xd7   : > { %v484_v5 = vsel %vm483_vm7, %v457_v1, %v482_v3 }
  0xd8   : > { %v486_v6 = vsel %vm485_vm8, %v464_v4, %v484_v5 }
  0xd9   : > { %488 = vst.msk [vmem:[%s247_s19] sm:$0xff] %vm270_vm2, %v486_v6 }
  0xda   : > { %785 = shalt.err (!%p782_p12)
}
  0xdb   : > { %640 = dma.vmem_to_hbm [thread:$0]  (%p928_p3), %s503_s20, 128, %s505_s24, %s490_s6  }
  0xdc PF: > { %s516_s10 = sand.u32 1, %s816_s15   ;;  %p1070_p13 = scmp.ge.s32.totalorder %s828_s18, 2 }
  0xdd   : > { %s517_s27 = scalar_lea.sflag [#allocation4], %s516_s10 }
  0xde   : > { %p651_p0 = pnand %p1070_p13, %p894_p6 }
  0xe0   : > { %p652_p5 = pneg %p651_p0 }
  0xe2   : > { %811 = dma.done.wait (%p652_p5), %s517_s27, 128  }
  0xe3   : > { %813 = vsyncadd (%p652_p5), %s517_s27, 4294967168  ;;  %p18_p7 = scmp.ge.s32.totalorder %s912_s29, 4   ;;  %s1071_s15 = smov %s820_s16 }
  0xe4   : > { %s1072_s16 = smov %s824_s17  ;;  %s1073_s17 = smov %s924_s8 }
  0xe5   : > { %s1074_s18 = smov %s912_s29  ;;  %20 = sbr.rel (!%p18_p7) target bundleno = 6 (0x6), region = 88 }
  0xea   :  { %523 = vsyncpa [#allocation3], 1 }
  0xeb   :  { %525 = vsyncpa [#allocation3 + $0x1], 1 }
  0xec   :  { %526 = vsyncpa [#allocation6], 1 }
  0xed   :  { %527 = vsyncpa [#allocation4], 1 }
  0xee   :  { %529 = vsyncpa [#allocation4 + $0x1], 1 }

// kernel: tpu_custom_call.1
= control target key start
LH: loop header
LB: loop body
LE: loop exit
PB: predicated region body
PF: predicated region fallthrough
CT: control target
= control target key end

     0   :  { %9 = vsyncpa [#allocation3], 0  ;;  %s1060_s0 = inlined_call_operand.vmem [shape: s32[16,1], index: 0, kind: input, shape index: {}]   ;;  %s1061_s1 = inlined_call_operand.hbm [shape: f32[16,8,32], index: 1, kind: input, shape index: {}]   ;;  %s1062_s2 = inlined_call_operand.hbm [shape: f32[32,32], index: 2, kind: input, shape index: {}]   ;;  %s1063_s3 = inlined_call_operand.vmem [shape: f32[1,32], index: 3, kind: input, shape index: {}]   ;;  %s1064_s4 = inlined_call_operand.hbm [shape: f32[16,32], index: 4, kind: output, shape index: {}]  }
   0x1   :  { %11 = vsyncpa [#allocation3 + $0x1], 0 }
   0x2   :  { %12 = vsyncpa [#allocation6], 0 }
   0x3   :  { %13 = vsyncpa [#allocation4], 0 }
   0x4   :  { %15 = vsyncpa [#allocation4 + $0x1], 0  ;;  %s859_s15 = smov 0   ;;  %s861_s16 = smov 0  }
   0x5   :  { %s863_s17 = smov 0   ;;  %s865_s18 = smov 0  }
   0x6 LB: > { %s880_s19 = sadd.s32 4294967295, %s828_s18   ;;  %s597_s20 = sadd.s32 4294967294, %s828_s18   ;;  %s828_s18 = sphi %s865_s18, %s1074_s18   ;;  %s824_s17 = sphi %s863_s17, %s1073_s17   ;;  %s820_s16 = sphi %s861_s16, %s1072_s16   ;;  %s816_s15 = sphi %s859_s15, %s1071_s15  }
   0x7   : > { %p67_p0 = scmp.ne.s32.totalorder %s820_s16, %s816_s15  ;;  %p68_p1 = scmp.eq.s32.totalorder %s880_s19, 0 }
   0x8   : > { %p133_p2 = scmp.eq.s32.totalorder %s880_s19, 1  ;;  %p139_p3 = scmp.eq.s32.totalorder %s597_s20, 1 }
   0x9   : > { %p889_p4 = por %p68_p1, %p67_p0  ;;  %p598_p5 = scmp.ge.s32.totalorder %s828_s18, 1 }
   0xa   : > { %p894_p6 = por %p139_p3, %p67_p0  ;;  %p146_p7 = scmp.lt.s32.totalorder %s828_s18, 3 }
   0xb   : > { %s157_s25 = sshll.u32 %s1062_s2, 4  ;;  %s830_s27 = smov [#allocation5]   ;;  %s158_s25 = int_to_ptr.hbm [resolvable:$true] %s157_s25 }
   0xc   : > { %p902_p8 = pnand %p598_p5, %p146_p7  ;;  %s159_s28 = sshll.u32 %s830_s27, 4  ;;  %s160_s28 = int_to_ptr.vmem [resolvable:$true] %s159_s28 }
   0xd   : > { %s912_s29 = sadd.s32 1, %s828_s18   ;;  %s831_s30 = smov 128  }
   0xe   : > { %p642_p9 = pneg %p902_p8  ;;  %s832_s5 = smov 8  }
   0xf   : > { %s51_s6 = ssub.s32 %s828_s18, %s912_s29  ;;  %s54_s7 = sadd.s32 1, %s824_s17 }
  0x10   : > { %p643_p10 = pnand %p642_p9, %p68_p1  ;;  %p52_p12 = scmp.eq.s32.totalorder %s51_s6, 0 }
  0x11   : > { %p61_p13 = scmp.ne.s32.totalorder %s824_s17, %s820_s16  ;;  %p62_p0 = scmp.eq.s32.totalorder %s828_s18, 0 }
  0x12   : > { %645 = dma.hbm_to_vmem [thread:$0]  (!%p643_p10), %s158_s25, 512, %s160_s28, [#allocation6], %s831_s30, %s831_s30, %s832_s5  }
  0x13   : > { %s924_s8 = scalar_select %p52_p12, %s824_s17, %s54_s7  }
  0x14   : > { %p928_p3 = por %p133_p2, %p61_p13  ;;  %p655_p5 = scmp.lt.s32.totalorder %s828_s18, 2 }
  0x15   : > { %s183_s10 = sand.u32 1, %s824_s17   ;;  %s621_s11 = sshll.u32 %s828_s18, 6 }
  0x16   : > { %p63_p7 = por %p62_p0, %p61_p13  ;;  %s601_s12 = sshll.u32 %s183_s10, 6 }
  0x17   : > { %s192_s20 = scalar_lea.hbm %s1061_s1, %s621_s11  ;;  %s187_s24 = scalar_lea.vmem [#allocation2], %s601_s12 }
  0x18   : > { %s193_s23 = sshll.u32 %s192_s20, 4  ;;  %s195_s25 = sshll.u32 %s187_s24, 4  ;;  %s194_s23 = int_to_ptr.hbm [resolvable:$true] %s193_s23  ;;  %s196_s25 = int_to_ptr.vmem [resolvable:$true] %s195_s25 }
  0x19   : > { %p938_p9 = pnand %p655_p5, %p63_p7  ;;  %s184_s28 = scalar_lea.sflag [#allocation3], %s183_s10 }
  0x1a   : > { %s728_s6 = sshra.s32 %s194_s23, 4  ;;  %s735_s12 = scalar_lea.hbm %s1061_s1, 128  ;;  %s729_s6 = int_to_ptr.hbm [resolvable:$true] %s728_s6 }
  0x1b   : > { %s730_s7 = scalar_lea.hbm %s729_s6, 64  ;;  %p732_p10 = pneg %p938_p9 }
  0x1c   : > { %p731_p2 = scmp.ne.s32.totalorder %s729_s6, %s730_s7  ;;  %p736_p0 = scmp.lt.s32.totalorder %s729_s6, %s1061_s1 }
  0x1d   : > { %p737_p5 = scmp.lt.s32.totalorder %s735_s12, %s730_s7 }
  0x1e   : > { %p733_p12 = pnand %p732_p10, %p731_p2 }
  0x1f   : > { %p738_p7 = por %p737_p5, %p736_p0 }
  0x20   : > { %p734_p13 = pneg %p733_p12 }
  0x22   : > { %p739_p11 = pnand %p738_p7, %p734_p13 }
  0x24   : > { %742 = shalt.err (!%p739_p11)
}
  0x25   : > { %649 = dma.hbm_to_vmem [thread:$0]  (!%p938_p9), %s194_s23, 1024, %s196_s25, %s184_s28, %s831_s30, %s831_s30, %s832_s5  }
  0x26   : > { %207 = sbr.rel (%p902_p8) target bundleno = 220 (0xdc), region = 36  ;;  %s958_s10 = sand.u32 (!%p902_p8), 1, %s820_s16  }
  0x27   : > { %s605_s24 = sshll.u32 (!%p902_p8), %s958_s10, 6  ;;  %s210_s6 = scalar_lea.sflag (!%p902_p8), [#allocation3], %s958_s10 }
  0x28   : > { %s962_s7 = scalar_lea.vmem (!%p902_p8), [#allocation2], %s605_s24 }
  0x2b   : > { %803 = dma.done.wait (%p889_p4), %s210_s6, 1024  }
  0x2c   : > { %805 = vsyncadd (%p889_p4), %s210_s6, 4294966272 }
  0x2d   : > { %807 = dma.done.wait (%p68_p1), [#allocation6], 512  }
  0x2e   : > { %809 = vsyncadd (%p68_p1), [#allocation6], 4294966784  ;;  %p248_p8 = scmp.lt.s32.totalorder %s880_s19, 1  ;;  %v833_v0 = vmov 0   ;;  %v343_v1 = vlaneseq  ;;  %v265_v2 = vld [vmem:[#allocation5 + $0x18] sm:$0xff]  ;;  %v264_v3 = vld [vmem:[#allocation5 + $0x10] sm:$0xff] }
  0x2f   : > { %694 = vset.pattern.permute.xlu0 %v833_v0  ;;  %695 = vset.pattern.permute.xlu1 %v833_v0  ;;  %v263_v6 = vld [vmem:[#allocation5 + $0x8] sm:$0xff]  ;;  %v262_v11 = vld [vmem:[#allocation5] sm:$0xff]  ;;  %vm270_vm2 = vcmask 261120   ;;  %v256_v20 = vld [vmem:[%s962_s7 + $0x10] sm:$0xff]  ;;  %s607_s28 = sshll.u32 %s958_s10, 3  ;;  %s618_s11 = sshll.u32 %s880_s19, 3 }
  0x30   : > { %s249_s26 = scalar_select %p248_p8, %s880_s19, 1  ;;  %696 = vset.pattern.permute.xlu2 %v833_v0  ;;  %v980_v4 = vshrl.u32 %v343_v1, 7  ;;  %307 = vmatpush.msra.mxu0 %v265_v2  ;;  %v254_v19 = vld [vmem:[%s962_s7] sm:$0xff]  ;;  %v260_v23 = vld [vmem:[%s962_s7 + $0x30] sm:$0xff]  ;;  %v255_v31 = vld [vmem:[%s962_s7 + $0x8] sm:$0xff] }
  0x31   : > { %622 = vmatpush.msra.mxu1 %v265_v2  ;;  %623 = vmatpush.msra.mxu2 %v265_v2  ;;  %v258_v22 = vld [vmem:[%s962_s7 + $0x20] sm:$0xff]  ;;  %v257_v32 = vld [vmem:[%s962_s7 + $0x18] sm:$0xff]  ;;  %v259_v34 = vld [vmem:[%s962_s7 + $0x28] sm:$0xff]  ;;  %s500_s14 = scalar_lea.hbm %s1064_s4, %s618_s11  ;;  %s247_s19 = scalar_lea.vmem [#allocation7], %s607_s28 }
  0x32   : > { %s608_s21 = sshll.u32 %s249_s26, 3  ;;  %624 = vmatpush.msra.mxu3 %v265_v2  ;;  %308 = vmatpush.msra.mxu0 %v264_v3  ;;  %v261_v35 = vld [vmem:[%s962_s7 + $0x38] sm:$0xff]  ;;  %v697_v42 = vld [vmem:[%s1063_s3] ss:$0 sm:$0xff]  ;;  %s502_s20 = sshll.u32 %s247_s19, 4  ;;  %s503_s20 = int_to_ptr.vmem [resolvable:$true] %s502_s20 }
  0x33   : > { %s251_s23 = scalar_lea.vmem %s1060_s0, %s608_s21  ;;  %625 = vmatpush.msra.mxu1 %v264_v3  ;;  %626 = vmatpush.msra.mxu2 %v264_v3  ;;  %s504_s24 = sshll.u32 %s500_s14, 4  ;;  %s505_s24 = int_to_ptr.hbm [resolvable:$true] %s504_s24 }
  0x34   : > { %v253_v5 = vld [vmem:[%s251_s23] sm:$0xff]  ;;  %627 = vmatpush.msra.mxu3 %v264_v3  ;;  %309 = vmatpush.msra.mxu0 %v263_v6  ;;  %s490_s6 = scalar_lea.sflag [#allocation4], %s958_s10  ;;  %s772_s7 = sshra.s32 %s505_s24, 4  ;;  %s773_s7 = int_to_ptr.hbm [resolvable:$true] %s772_s7 }
  0x35   : > { %v345_v7 = vperm.slane %v253_v5, 0  ;;  %v337_v8 = vrot.slane %v253_v5, 2  ;;  %v336_v9 = vrot.slane %v253_v5, 1  ;;  %v338_v10 = vrot.slane %v253_v5, 3  ;;  %628 = vmatpush.msra.mxu1 %v263_v6  ;;  %629 = vmatpush.msra.mxu2 %v263_v6  ;;  %s774_s26 = scalar_lea.hbm %s773_s7, 8  ;;  %s778_s5 = scalar_lea.hbm %s1064_s4, 16 }
  0x36   : > { %v339_v13 = vrot.slane %v253_v5, 4  ;;  %630 = vmatpush.msra.mxu3 %v263_v6  ;;  %v340_v17 = vrot.slane %v253_v5, 5  ;;  %310 = vmatpush.msra.mxu0 %v262_v11  ;;  %v341_v24 = vrot.slane %v253_v5, 6  ;;  %v342_v27 = vrot.slane %v253_v5, 7  ;;  %p775_p1 = scmp.ne.s32.totalorder %s773_s7, %s774_s26  ;;  %p779_p9 = scmp.lt.s32.totalorder %s773_s7, %s1064_s4 }
  0x37   : > { %vm353_vm0 = vcmp.lt.s32.totalorder %v980_v4, %v345_v7  ;;  %v347_v12 = vperm.slane %v337_v8, 0  ;;  %v346_v15 = vperm.slane %v336_v9, 0  ;;  %v348_v21 = vperm.slane %v338_v10, 0  ;;  %631 = vmatpush.msra.mxu1 %v262_v11  ;;  %632 = vmatpush.msra.mxu2 %v262_v11  ;;  %p780_p2 = scmp.lt.s32.totalorder %s778_s5, %s774_s26 }
  0x38   : > { %v361_v14 = vsel %vm353_vm0, 1, %v833_v0  ;;  %v349_v16 = vperm.slane %v339_v13, 0  ;;  %633 = vmatpush.msra.mxu3 %v262_v11  ;;  %609 = vmatmul.msk.f32.vlgmr.msra.gmra.mxu0 %vm270_vm2, %v254_v19  ;;  %v350_v26 = vperm.slane %v340_v17, 0  ;;  %v351_v29 = vperm.slane %v341_v24, 0  ;;  %p776_p4 = pnand %p775_p1, %p928_p3 }
  0x39   : > { %vm355_vm1 = vcmp.lt.s32.totalorder %v980_v4, %v347_v12  ;;  %370 = vperm.xlu0 %694, %v361_v14   ;;  %vm354_vm4 = vcmp.lt.s32.totalorder %v980_v4, %v346_v15  ;;  %611 = vmatmul.msk.f32.vlgmr.msra.gmra.mxu1 %vm270_vm2, %v256_v20  ;;  %vm356_vm5 = vcmp.lt.s32.totalorder %v980_v4, %v348_v21  ;;  %v352_v33 = vperm.slane %v342_v27, 0  ;;  %p781_p10 = por %p780_p2, %p779_p9 }
  0x3a   : > { %v363_v18 = vsel %vm355_vm1, 1, %v833_v0  ;;  %vm357_vm3 = vcmp.lt.s32.totalorder %v980_v4, %v349_v16  ;;  %613 = vmatmul.msk.f32.vlgmr.msra.gmra.mxu2 %vm270_vm2, %v258_v22  ;;  %615 = vmatmul.msk.f32.vlgmr.msra.gmra.mxu3 %vm270_vm2, %v260_v23  ;;  %v362_v28 = vsel %vm354_vm4, 1, %v833_v0  ;;  %v364_v30 = vsel %vm356_vm5, 1, %v833_v0  ;;  %p777_p11 = pneg %p776_p4 }
  0x3b   : > { %376 = vperm.xlu1 %695, %v363_v18   ;;  %v365_v25 = vsel %vm357_vm3, 1, %v833_v0  ;;  %vm358_vm6 = vcmp.lt.s32.totalorder %v980_v4, %v350_v26  ;;  %vm359_vm7 = vcmp.lt.s32.totalorder %v980_v4, %v351_v29  ;;  %vm360_vm8 = vcmp.lt.s32.totalorder %v980_v4, %v352_v33 }
  0x3c   : > { %382 = vperm.xlu2 %696, %v365_v25   ;;  %v366_v36 = vsel %vm358_vm6, 1, %v833_v0  ;;  %v367_v37 = vsel %vm359_vm7, 1, %v833_v0  ;;  %v368_v38 = vsel %vm360_vm8, 1, %v833_v0  ;;  %vm473_vm1 = vcmask 1041409   ;;  %p782_p12 = pnand %p781_p10, %p777_p11 }
  0x3d   : > { %vm475_vm3 = vcmask 1042434   ;;  %vm477_vm4 = vcmask 1043459   ;;  %vm479_vm5 = vcmask 1044484   ;;  %vm481_vm6 = vcmask 1045509  }
  0x3e   : > { %vm483_vm7 = vcmask 1046534   ;;  %vm485_vm8 = vcmask 1047559  }
  0x40   : > { %610 = vmatmul.msk.f32.gmra.mxu0 %vm270_vm2, %v255_v31 }
  0x41   : > { %373 = vperm.xlu0 %694, %v362_v28   ;;  %612 = vmatmul.msk.f32.gmra.mxu1 %vm270_vm2, %v257_v32 }
  0x42   : > { %614 = vmatmul.msk.f32.gmra.mxu2 %vm270_vm2, %v259_v34  ;;  %616 = vmatmul.msk.f32.gmra.mxu3 %vm270_vm2, %v261_v35 }
  0x43   : > { %379 = vperm.xlu1 %695, %v364_v30  }
  0x44   : > { %385 = vperm.xlu2 %696, %v366_v36  }
  0x49   : > { %388 = vperm.xlu0 %694, %v367_v37  }
  0x4b   : > { %391 = vperm.xlu1 %695, %v368_v38  }
  0x96   : > { %v383_v50 = vpop.permute.xlu2 %382 }
  0x97   : > { %vm397_vm11 = vcmp.eq.s32.totalorder %v383_v50, 1 }
  0x9e   : > { %v386_v15 = vpop.permute.xlu2 %385 }
  0x9f   : > { %vm398_vm0 = vcmp.eq.s32.totalorder %v386_v15, 1 }
  0xab   : > { %v371_v39 = vpop.permute.xlu0 %370 }
  0xac   : > { %vm393_vm9 = vcmp.eq.s32.totalorder %v371_v39, 1 }
  0xad   : > { %v377_v40 = vpop.permute.xlu1 %376 }
  0xae   : > { %vm395_vm10 = vcmp.eq.s32.totalorder %v377_v40, 1 }
  0xb3   : > { %v374_v41 = vpop.permute.xlu0 %373 }
  0xb4   : > { %vm394_vm13 = vcmp.eq.s32.totalorder %v374_v41, 1 }
  0xb5   : > { %v312_v43 = vpop.f32.mrf.mxu0  ;;  %v380_v49 = vpop.permute.xlu1 %379 }
  0xb6   : > { %v318_v44 = vpop.f32.mrf.mxu1  ;;  %v313_v45 = vadd.f32 %v697_v42, %v312_v43  ;;  %vm396_vm14 = vcmp.eq.s32.totalorder %v380_v49, 1 }
  0xb7   : > { %v319_v46 = vadd.f32 %v697_v42, %v318_v44 }
  0xb8   : > { %v401_v47 = vsel %vm393_vm9, %v313_v45, -10000.0 }
  0xb9   : > { %v403_v48 = vsel %vm395_vm10, %v319_v46, -10000.0  ;;  %v409_v51 = vsel %vm270_vm2, %v401_v47, -inf }
  0xba   : > { %v423_v52 = vsel %vm270_vm2, %v403_v48, -inf  ;;  %v410_v53 = vrot.slane %v409_v51, 4 }
  0xbb   : > { %v424_v54 = vrot.slane %v423_v52, 4  ;;  %v389_v55 = vpop.permute.xlu0 %388 }
  0xbc   : > { %v411_v58 = vmax.f32 %v409_v51, %v410_v53  ;;  %vm399_vm12 = vcmp.eq.s32.totalorder %v389_v55, 1 }
  0xbd   : > { %v324_v56 = vpop.f32.mrf.mxu2  ;;  %v330_v57 = vpop.f32.mrf.mxu3  ;;  %v425_v1 = vmax.f32 %v423_v52, %v424_v54 }
  0xbe   : > { %v325_v59 = vadd.f32 %v697_v42, %v324_v56  ;;  %v331_v60 = vadd.f32 %v697_v42, %v330_v57  ;;  %v315_v61 = vpop.f32.mrf.mxu0  ;;  %v321_v62 = vpop.f32.mrf.mxu1  ;;  %v412_v6 = vrot.slane %v411_v58, 2 }
  0xbf   : > { %v316_v63 = vadd.f32 %v697_v42, %v315_v61  ;;  %v322_v0 = vadd.f32 %v697_v42, %v321_v62  ;;  %v426_v12 = vrot.slane %v425_v1, 2  ;;  %v392_v13 = vpop.permute.xlu1 %391 }
  0xc0   : > { %v405_v2 = vsel %vm397_vm11, %v325_v59, -10000.0  ;;  %v407_v3 = vsel %vm399_vm12, %v331_v60, -10000.0  ;;  %v413_v20 = vmax.f32 %v411_v58, %v412_v6  ;;  %vm400_vm15 = vcmp.eq.s32.totalorder %v392_v13, 1 }
  0xc1   : > { %v437_v4 = vsel %vm270_vm2, %v405_v2, -inf  ;;  %v451_v5 = vsel %vm270_vm2, %v407_v3, -inf  ;;  %v402_v8 = vsel %vm394_vm13, %v316_v63, -10000.0  ;;  %v404_v9 = vsel %vm396_vm14, %v322_v0, -10000.0 }
  0xc2   : > { %v438_v7 = vrot.slane %v437_v4, 4  ;;  %v416_v10 = vsel %vm270_vm2, %v402_v8, -inf  ;;  %v430_v11 = vsel %vm270_vm2, %v404_v9, -inf  ;;  %v452_v14 = vrot.slane %v451_v5, 4 }
  0xc3   : > { %v417_v16 = vrot.slane %v416_v10, 4  ;;  %v431_v17 = vrot.slane %v430_v11, 4  ;;  %v427_v26 = vmax.f32 %v425_v1, %v426_v12  ;;  %v414_v32 = vrot.slane %v413_v20, 1 }
  0xc4   : > { %v439_v21 = vmax.f32 %v437_v4, %v438_v7  ;;  %v453_v27 = vmax.f32 %v451_v5, %v452_v14 }
  0xc5   : > { %v327_v18 = vpop.f32.mrf.mxu2  ;;  %v333_v19 = vpop.f32.mrf.mxu3  ;;  %v418_v22 = vmax.f32 %v416_v10, %v417_v16  ;;  %v432_v23 = vmax.f32 %v430_v11, %v431_v17  ;;  %v428_v38 = vrot.slane %v427_v26, 1  ;;  %v415_v43 = vmax.f32 %v413_v20, %v414_v32 }
  0xc6   : > { %v328_v24 = vadd.f32 %v697_v42, %v327_v18  ;;  %v334_v25 = vadd.f32 %v697_v42, %v333_v19  ;;  %v440_v33 = vrot.slane %v439_v21, 2  ;;  %v454_v39 = vrot.slane %v453_v27, 2 }
  0xc7   : > { %v419_v28 = vrot.slane %v418_v22, 2  ;;  %v433_v29 = vrot.slane %v432_v23, 2  ;;  %v429_v49 = vmax.f32 %v427_v26, %v428_v38 }
  0xc8   : > { %v406_v30 = vsel %vm398_vm0, %v328_v24, -10000.0  ;;  %v408_v31 = vsel %vm400_vm15, %v334_v25, -10000.0  ;;  %v441_v44 = vmax.f32 %v439_v21, %v440_v33  ;;  %v455_v50 = vmax.f32 %v453_v27, %v454_v39 }
  0xc9   : > { %v420_v34 = vmax.f32 %v418_v22, %v419_v28  ;;  %v434_v35 = vmax.f32 %v432_v23, %v433_v29  ;;  %v444_v36 = vsel %vm270_vm2, %v406_v30, -inf  ;;  %v458_v37 = vsel %vm270_vm2, %v408_v31, -inf }
  0xca   : > { %v445_v41 = vrot.slane %v444_v36, 4  ;;  %v459_v42 = vrot.slane %v458_v37, 4  ;;  %v442_v54 = vrot.slane %v441_v44, 1  ;;  %v456_v59 = vrot.slane %v455_v50, 1 }
  0xcb   : > { %v421_v40 = vrot.slane %v420_v34, 1  ;;  %v435_v46 = vrot.slane %v434_v35, 1 }
  0xcc   : > { %v446_v47 = vmax.f32 %v444_v36, %v445_v41  ;;  %v460_v48 = vmax.f32 %v458_v37, %v459_v42  ;;  %v443_v63 = vmax.f32 %v441_v44, %v442_v54  ;;  %v457_v1 = vmax.f32 %v455_v50, %v456_v59 }
  0xcd   : > { %v422_v45 = vmax.f32 %v420_v34, %v421_v40  ;;  %v436_v56 = vmax.f32 %v434_v35, %v435_v46 }
  0xce   : > { %v447_v52 = vrot.slane %v446_v47, 2  ;;  %v461_v53 = vrot.slane %v460_v48, 2 }
  0xcf   : > { %v474_v51 = vsel %vm473_vm1, %v422_v45, %v415_v43 }
  0xd0   : > { %v476_v55 = vsel %vm475_vm3, %v429_v49, %v474_v51  ;;  %v448_v57 = vmax.f32 %v446_v47, %v447_v52  ;;  %v462_v58 = vmax.f32 %v460_v48, %v461_v53 }
  0xd1   : > { %v478_v60 = vsel %vm477_vm4, %v436_v56, %v476_v55 }
  0xd2   : > { %v449_v61 = vrot.slane %v448_v57, 1  ;;  %v463_v62 = vrot.slane %v462_v58, 1  ;;  %v480_v2 = vsel %vm479_vm5, %v443_v63, %v478_v60 }
  0xd4   : > { %v450_v0 = vmax.f32 %v448_v57, %v449_v61  ;;  %v464_v4 = vmax.f32 %v462_v58, %v463_v62 }
  0xd6   : > { %v482_v3 = vsel %vm481_vm6, %v450_v0, %v480_v2 }
  0xd7   : > { %v484_v5 = vsel %vm483_vm7, %v457_v1, %v482_v3 }
  0xd8   : > { %v486_v6 = vsel %vm485_vm8, %v464_v4, %v484_v5 }
  0xd9   : > { %488 = vst.msk [vmem:[%s247_s19] sm:$0xff] %vm270_vm2, %v486_v6 }
  0xda   : > { %785 = shalt.err (!%p782_p12)
}
  0xdb   : > { %640 = dma.vmem_to_hbm [thread:$0]  (%p928_p3), %s503_s20, 128, %s505_s24, %s490_s6  }
  0xdc PF: > { %s516_s10 = sand.u32 1, %s816_s15   ;;  %p1070_p13 = scmp.ge.s32.totalorder %s828_s18, 2 }
  0xdd   : > { %s517_s27 = scalar_lea.sflag [#allocation4], %s516_s10 }
  0xde   : > { %p651_p0 = pnand %p1070_p13, %p894_p6 }
  0xe0   : > { %p652_p5 = pneg %p651_p0 }
  0xe2   : > { %811 = dma.done.wait (%p652_p5), %s517_s27, 128  }
  0xe3   : > { %813 = vsyncadd (%p652_p5), %s517_s27, 4294967168  ;;  %p18_p7 = scmp.ge.s32.totalorder %s912_s29, 4   ;;  %s1071_s15 = smov %s820_s16 }
  0xe4   : > { %s1072_s16 = smov %s824_s17  ;;  %s1073_s17 = smov %s924_s8 }
  0xe5   : > { %s1074_s18 = smov %s912_s29  ;;  %20 = sbr.rel (!%p18_p7) target bundleno = 6 (0x6), region = 88 }
  0xea   :  { %523 = vsyncpa [#allocation3], 1 }
  0xeb   :  { %525 = vsyncpa [#allocation3 + $0x1], 1 }
  0xec   :  { %526 = vsyncpa [#allocation6], 1 }
  0xed   :  { %527 = vsyncpa [#allocation4], 1 }
  0xee   :  { %529 = vsyncpa [#allocation4 + $0x1], 1 }

</bundles_post_ra>
